<compile_context>
chip_gen: v7x
topology: tpu7x:2x2x1
jax: 0.10.0
libtpu: 0.0.40
codegen_flags: <defaults>
</compile_context>

<pallas_src>
import jax
import jax.numpy as jnp
from jax import lax
from jax.experimental import pallas as pl
from jax.experimental.pallas import tpu as pltpu


def _fp_kernel(pts_ref, ctrs_ref, cfeat_ref, pfeat_ref, wc_ref, wp_ref, b_ref,
               out_ref):
    # Per-tile views (batch dim squeezed):
    #   pts  [3, TN], ctrs [3, M], cfeat [Cc, M], pfeat [Cp, TN]
    #   wc   [Cout, Cc], wp [Cout, Cp], b [Cout, 1], out [Cout, TN]
    pts = pts_ref[...].astype(jnp.float32)       # [3, TN]
    ctrs = ctrs_ref[...].astype(jnp.float32)     # [3, M]

    M = ctrs.shape[1]
    TN = pts.shape[1]

    # ---- squared pairwise distances [M, TN]; cross term on the MXU ----
    ctrs_t = jnp.transpose(ctrs)                                      # [M, 3]
    cross = jnp.dot(ctrs_t, pts, preferred_element_type=jnp.float32)  # [M, TN]
    c_sq = jnp.sum(ctrs_t * ctrs_t, axis=1, keepdims=True)            # [M, 1]
    p_sq = jnp.sum(pts * pts, axis=0, keepdims=True)                  # [1, TN]
    # clamp: cancellation in the expansion can give tiny negatives
    dist = jnp.maximum(c_sq + p_sq - 2.0 * cross, 0.0)                # [M, TN]

    # ---- iterative 3-NN along axis 0 (centers); build wmat [M, TN] ----
    iota_m = lax.broadcasted_iota(jnp.int32, (M, TN), 0)
    big = jnp.float32(1e30)
    d = dist
    wsum = jnp.zeros((1, TN), jnp.float32)
    wmat = jnp.zeros((M, TN), jnp.float32)
    for _ in range(3):
        mind = jnp.min(d, axis=0, keepdims=True)               # [1, TN]
        cand = jnp.where(d == mind, iota_m, jnp.int32(M))      # [M, TN]
        idx = jnp.min(cand, axis=0, keepdims=True)             # argmin (lowest idx)
        sel = iota_m == idx                                    # [M, TN] one-hot
        recip = pl.reciprocal(mind + 1e-8, approx=True)        # [1, TN] (EUP)
        wmat = wmat + jnp.where(sel, recip, 0.0)
        wsum = wsum + recip
        d = jnp.where(sel, big, d)

    # ---- interpolate on the MXU: [Cc, M] x [M, TN] -> [Cc, TN] ----
    cfeat = cfeat_ref[...]
    interp = jnp.dot(cfeat, wmat.astype(cfeat.dtype),
                     preferred_element_type=jnp.float32)        # [Cc, TN]
    # normalize after the matmul (Cc*TN elems instead of M*TN divide)
    interp = interp * pl.reciprocal(wsum, approx=True)

    # ---- SharedMLP (1x1 conv + folded BN + ReLU), split weights (no concat) ----
    out = jnp.dot(wc_ref[...].astype(jnp.float32), interp,
                  preferred_element_type=jnp.float32)           # [Cout, TN]
    out = out + jnp.dot(wp_ref[...], pfeat_ref[...],
                        preferred_element_type=jnp.float32)
    out = out + b_ref[...]
    out_ref[...] = jnp.maximum(out, 0.0).astype(out_ref.dtype)


def _pick_tile_n(N, M, cc, cp, cout):
    """Largest lane-aligned TN that divides N and fits a conservative VMEM budget
    (sized under the smallest default scoped limit so it is safe on v5e/v6e/v7x)."""
    budget = 12 * 1024 * 1024
    for tn in (2048, 1024, 512, 256, 128):
        if N % tn == 0:
            # f32 temporaries ~4 copies of [M, TN] + double-buffered point tiles
            need = 4 * tn * (4 * M + 2 * (3 + cp + cout)) + 8 * M * (3 + cc)
            if need <= budget:
                return tn
    return N


def pointnet_fp_forward(points_coords, centers_coords, centers_features,
                        points_features, w_eff, b_eff):
    # TODO(synk): 3-input variant (points_features is None) not implemented here;
    # this wrapper mirrors the 4-input path of the PyTorch module.
    B, _, N = points_coords.shape
    M = centers_coords.shape[2]
    Cc = centers_features.shape[1]
    Cp = points_features.shape[1]
    Cout, Cin = w_eff.shape
    assert Cin == Cc + Cp

    # Split the folded conv+BN weight so the kernel never materializes a concat.
    w_c = w_eff[:, :Cc]
    w_p = w_eff[:, Cc:]

    TN = _pick_tile_n(N, M, Cc, Cp, Cout)
    n_tiles = N // TN

    flops = 2 * B * N * (M * (3 + Cc) + Cout * (Cc + Cp))
    bytes_accessed = (points_coords.size + centers_coords.size
                      + centers_features.size + points_features.size
                      + w_eff.size + b_eff.size + B * Cout * N) * 4
    cost = pl.CostEstimate(flops=flops, transcendentals=4 * B * N,
                           bytes_accessed=bytes_accessed)

    mlp_out = pl.pallas_call(
        _fp_kernel,
        out_shape=jax.ShapeDtypeStruct((B, Cout, N), jnp.float32),
        grid_spec=pltpu.PrefetchScalarGridSpec(
            num_scalar_prefetch=0,
            grid=(B, n_tiles),
            in_specs=[
                pl.BlockSpec((None, 3, TN), lambda b, n: (b, 0, n)),
                pl.BlockSpec((None, 3, M), lambda b, n: (b, 0, 0)),
                pl.BlockSpec((None, Cc, M), lambda b, n: (b, 0, 0)),
                pl.BlockSpec((None, Cp, TN), lambda b, n: (b, 0, n)),
                pl.BlockSpec((Cout, Cc), lambda b, n: (0, 0)),
                pl.BlockSpec((Cout, Cp), lambda b, n: (0, 0)),
                pl.BlockSpec((Cout, 1), lambda b, n: (0, 0)),
            ],
            out_specs=pl.BlockSpec((None, Cout, TN), lambda b, n: (b, 0, n)),
        ),
        compiler_params=pltpu.CompilerParams(
            dimension_semantics=("parallel", "parallel"),
            vmem_limit_bytes=32 * 1024 * 1024),
        cost_estimate=cost,
    )(points_coords, centers_coords, centers_features, points_features,
      w_c, w_p, b_eff)
    # Module returns (mlp(interpolated ++ skip), points_coords)
    return mlp_out, points_coords


def _reference(points_coords, centers_coords, centers_features,
               points_features, w_eff, b_eff):
    # Pure-JAX reference for correctness check.
    d = jnp.sum(
        (points_coords[:, :, :, None] - centers_coords[:, :, None, :]) ** 2,
        axis=1)                                                  # [B,N,M]
    neg, idx = lax.top_k(-d, 3)                                  # [B,N,3]
    dist3 = -neg
    recip = 1.0 / (dist3 + 1e-8)
    w = recip / jnp.sum(recip, axis=-1, keepdims=True)
    gathered = jnp.take_along_axis(
        centers_features[:, :, None, :], idx[:, None, :, :], axis=3)  # [B,C,N,3]
    interp = jnp.sum(gathered * w[:, None, :, :], axis=-1)       # [B,C,N]
    feat = jnp.concatenate([interp, points_features], axis=1)
    out = jnp.einsum("oc,bcn->bon", w_eff, feat) + b_eff[None]
    return jnp.maximum(out, 0.0)


if __name__ == "__main__":
    # Small shapes: B=2, N=128 target points, M=32 centers,
    # centers_features C=8, points_features C=8 -> in_channels=16, out_channels=32.
    B, N, M = 2, 128, 32
    Cc, Cp, Cout = 8, 8, 32
    Cin = Cc + Cp

    key = jax.random.PRNGKey(0)
    k1, k2, k3, k4, k5, k6 = jax.random.split(key, 6)
    points_coords = jax.random.normal(k1, (B, 3, N), jnp.float32)
    centers_coords = jax.random.normal(k2, (B, 3, M), jnp.float32)
    centers_features = jax.random.normal(k3, (B, Cc, M), jnp.float32)
    points_features = jax.random.normal(k4, (B, Cp, N), jnp.float32)

    # SharedMLP params (Conv1d(Cin, Cout, 1) + BatchNorm1d(Cout) eval-mode),
    # deterministic init; BN folded into effective weight/bias (glue, not kernel).
    conv_w = jax.random.normal(k5, (Cout, Cin), jnp.float32) * 0.1
    conv_b = jax.random.normal(k6, (Cout,), jnp.float32) * 0.01
    bn_gamma = jnp.ones((Cout,), jnp.float32)
    bn_beta = jnp.zeros((Cout,), jnp.float32)
    bn_mean = jnp.zeros((Cout,), jnp.float32)
    bn_var = jnp.ones((Cout,), jnp.float32)
    bn_eps = 1e-5
    scale = bn_gamma / jnp.sqrt(bn_var + bn_eps)
    w_eff = conv_w * scale[:, None]                              # [Cout, Cin]
    b_eff = ((conv_b - bn_mean) * scale + bn_beta)[:, None]      # [Cout, 1]

    out, coords_out = pointnet_fp_forward(
        points_coords, centers_coords, centers_features, points_features,
        w_eff, b_eff)
    out = jax.block_until_ready(out)

    ref = _reference(points_coords, centers_coords, centers_features,
                     points_features, w_eff, b_eff)
    assert out.shape == (B, Cout, N)
    assert coords_out.shape == (B, 3, N)
    # approx-reciprocal (EUP) normalization + MXU distance expansion -> slightly
    # looser tolerance than exact-divide reference.
    assert jnp.allclose(out, ref, rtol=2e-3, atol=2e-3), "mismatch vs reference"

    print("KERNEL_OK")
</pallas_src>

<mosaic_0001>
module attributes {stable_mosaic.version = 11 : i64} {
  func.func @_fp_kernel(%arg0: i32, %arg1: i32, %arg2: memref<1x3x128xf32, #tpu.memory_space<vmem>>, %arg3: memref<1x3x32xf32, #tpu.memory_space<vmem>>, %arg4: memref<1x8x32xf32, #tpu.memory_space<vmem>>, %arg5: memref<1x8x128xf32, #tpu.memory_space<vmem>>, %arg6: memref<32x8xf32, #tpu.memory_space<vmem>>, %arg7: memref<32x8xf32, #tpu.memory_space<vmem>>, %arg8: memref<32x1xf32, #tpu.memory_space<vmem>>, %arg9: memref<1x32x128xf32, #tpu.memory_space<vmem>>) attributes {dimension_semantics = [#tpu.dimension_semantics<parallel>, #tpu.dimension_semantics<parallel>], iteration_bounds = array<i64: 2, 1>, scalar_prefetch = 0 : i64, scratch_operands = 0 : i64, tpu.core_type = #tpu.core_type<tc>, window_params = [{transform_indices = @transform_0, window_bounds = array<i64: 1, 3, 128>}, {transform_indices = @transform_1, window_bounds = array<i64: 1, 3, 32>}, {transform_indices = @transform_2, window_bounds = array<i64: 1, 8, 32>}, {transform_indices = @transform_3, window_bounds = array<i64: 1, 8, 128>}, {pipeline_mode = #tpu.pipeline_mode<synchronous>, transform_indices = @transform_4, window_bounds = array<i64: 32, 8>}, {pipeline_mode = #tpu.pipeline_mode<synchronous>, transform_indices = @transform_5, window_bounds = array<i64: 32, 8>}, {pipeline_mode = #tpu.pipeline_mode<synchronous>, transform_indices = @transform_6, window_bounds = array<i64: 32, 1>}, {transform_indices = @transform_7, window_bounds = array<i64: 1, 32, 128>}]} {
    %c0 = arith.constant 0 : index
    %c0_0 = arith.constant 0 : index
    %c0_1 = arith.constant 0 : index
    %0 = vector.load %arg2[%c0, %c0_0, %c0_1] : memref<1x3x128xf32, #tpu.memory_space<vmem>>, vector<1x3x128xf32>
    %1 = vector.shape_cast %0 : vector<1x3x128xf32> to vector<3x128xf32>
    %c0_2 = arith.constant 0 : index
    %c0_3 = arith.constant 0 : index
    %c0_4 = arith.constant 0 : index
    %2 = vector.load %arg3[%c0_2, %c0_3, %c0_4] : memref<1x3x32xf32, #tpu.memory_space<vmem>>, vector<1x3x32xf32>
    %3 = vector.shape_cast %2 : vector<1x3x32xf32> to vector<3x32xf32>
    %4 = tpu.transpose %3, [1, 0] : vector<3x32xf32> -> vector<32x3xf32>
    %cst = arith.constant dense<0.000000e+00> : vector<32x128xf32>
    %5 = tpu.matmul %4, %1, %cst {dimension_numbers = #tpu.dot_dimension_numbers<[1], [0], [0], [1], [0, 0, 1, 1], [], []>} : vector<32x3xf32>, vector<3x128xf32>, vector<32x128xf32> -> vector<32x128xf32>
    %6 = arith.mulf %4, %4 : vector<32x3xf32>
    %cst_5 = arith.constant dense<0.000000e+00> : vector<32xf32>
    %7 = vector.multi_reduction <add>, %6, %cst_5 [1] : vector<32x3xf32> to vector<32xf32>
    %8 = vector.shape_cast %7 : vector<32xf32> to vector<32x1xf32>
    %9 = arith.mulf %1, %1 : vector<3x128xf32>
    %cst_6 = arith.constant dense<0.000000e+00> : vector<128xf32>
    %10 = vector.multi_reduction <add>, %9, %cst_6 [0] : vector<3x128xf32> to vector<128xf32>
    %11 = vector.shape_cast %10 : vector<128xf32> to vector<1x128xf32>
    %12 = vector.broadcast %8 : vector<32x1xf32> to vector<32x128xf32>
    %13 = vector.broadcast %11 : vector<1x128xf32> to vector<32x128xf32>
    %14 = arith.addf %12, %13 : vector<32x128xf32>
    %cst_7 = arith.constant 2.000000e+00 : f32
    %15 = vector.broadcast %cst_7 : f32 to vector<32x128xf32>
    %16 = arith.mulf %15, %5 : vector<32x128xf32>
    %17 = arith.subf %14, %16 : vector<32x128xf32>
    %cst_8 = arith.constant 0.000000e+00 : f32
    %18 = vector.broadcast %cst_8 : f32 to vector<32x128xf32>
    %19 = arith.maximumf %17, %18 : vector<32x128xf32>
    %20 = tpu.iota {dimensions = array<i32: 0>} : vector<32x128xi32>
    %cst_9 = arith.constant 0.000000e+00 : f32
    %21 = vector.broadcast %cst_9 : f32 to vector<1x128xf32>
    %cst_10 = arith.constant 0.000000e+00 : f32
    %22 = vector.broadcast %cst_10 : f32 to vector<32x128xf32>
    %cst_11 = arith.constant dense<0x7F800000> : vector<128xf32>
    %23 = vector.multi_reduction <minimumf>, %19, %cst_11 [0] : vector<32x128xf32> to vector<128xf32>
    %24 = vector.shape_cast %23 : vector<128xf32> to vector<1x128xf32>
    %25 = vector.broadcast %24 : vector<1x128xf32> to vector<32x128xf32>
    %26 = arith.cmpf oeq, %19, %25 : vector<32x128xf32>
    %c32_i32 = arith.constant 32 : i32
    %27 = vector.broadcast %c32_i32 : i32 to vector<32x128xi32>
    %28 = arith.select %26, %20, %27 : vector<32x128xi1>, vector<32x128xi32>
    %cst_12 = arith.constant dense<2147483647> : vector<128xi32>
    %29 = vector.multi_reduction <minsi>, %28, %cst_12 [0] : vector<32x128xi32> to vector<128xi32>
    %30 = vector.shape_cast %29 : vector<128xi32> to vector<1x128xi32>
    %31 = vector.broadcast %30 : vector<1x128xi32> to vector<32x128xi32>
    %32 = arith.cmpi eq, %20, %31 : vector<32x128xi32>
    %cst_13 = arith.constant 9.99999993E-9 : f32
    %33 = vector.broadcast %cst_13 : f32 to vector<1x128xf32>
    %34 = arith.addf %24, %33 : vector<1x128xf32>
    %35 = tpu.reciprocal %34 {approx = true} : vector<1x128xf32> -> vector<1x128xf32>
    %cst_14 = arith.constant 0.000000e+00 : f32
    %36 = vector.shape_cast %35 : vector<1x128xf32> to vector<1x128xf32>
    %37 = vector.broadcast %36 : vector<1x128xf32> to vector<32x128xf32>
    %38 = vector.broadcast %cst_14 : f32 to vector<32x128xf32>
    %39 = arith.select %32, %37, %38 : vector<32x128xi1>, vector<32x128xf32>
    %40 = arith.addf %22, %39 : vector<32x128xf32>
    %41 = arith.addf %21, %35 : vector<1x128xf32>
    %cst_15 = arith.constant 1.000000e+30 : f32
    %42 = vector.broadcast %cst_15 : f32 to vector<32x128xf32>
    %43 = arith.select %32, %42, %19 : vector<32x128xi1>, vector<32x128xf32>
    %cst_16 = arith.constant dense<0x7F800000> : vector<128xf32>
    %44 = vector.multi_reduction <minimumf>, %43, %cst_16 [0] : vector<32x128xf32> to vector<128xf32>
    %45 = vector.shape_cast %44 : vector<128xf32> to vector<1x128xf32>
    %46 = vector.broadcast %45 : vector<1x128xf32> to vector<32x128xf32>
    %47 = arith.cmpf oeq, %43, %46 : vector<32x128xf32>
    %c32_i32_17 = arith.constant 32 : i32
    %48 = vector.broadcast %c32_i32_17 : i32 to vector<32x128xi32>
    %49 = arith.select %47, %20, %48 : vector<32x128xi1>, vector<32x128xi32>
    %cst_18 = arith.constant dense<2147483647> : vector<128xi32>
    %50 = vector.multi_reduction <minsi>, %49, %cst_18 [0] : vector<32x128xi32> to vector<128xi32>
    %51 = vector.shape_cast %50 : vector<128xi32> to vector<1x128xi32>
    %52 = vector.broadcast %51 : vector<1x128xi32> to vector<32x128xi32>
    %53 = arith.cmpi eq, %20, %52 : vector<32x128xi32>
    %cst_19 = arith.constant 9.99999993E-9 : f32
    %54 = vector.broadcast %cst_19 : f32 to vector<1x128xf32>
    %55 = arith.addf %45, %54 : vector<1x128xf32>
    %56 = tpu.reciprocal %55 {approx = true} : vector<1x128xf32> -> vector<1x128xf32>
    %cst_20 = arith.constant 0.000000e+00 : f32
    %57 = vector.shape_cast %56 : vector<1x128xf32> to vector<1x128xf32>
    %58 = vector.broadcast %57 : vector<1x128xf32> to vector<32x128xf32>
    %59 = vector.broadcast %cst_20 : f32 to vector<32x128xf32>
    %60 = arith.select %53, %58, %59 : vector<32x128xi1>, vector<32x128xf32>
    %61 = arith.addf %40, %60 : vector<32x128xf32>
    %62 = arith.addf %41, %56 : vector<1x128xf32>
    %cst_21 = arith.constant 1.000000e+30 : f32
    %63 = vector.broadcast %cst_21 : f32 to vector<32x128xf32>
    %64 = arith.select %53, %63, %43 : vector<32x128xi1>, vector<32x128xf32>
    %cst_22 = arith.constant dense<0x7F800000> : vector<128xf32>
    %65 = vector.multi_reduction <minimumf>, %64, %cst_22 [0] : vector<32x128xf32> to vector<128xf32>
    %66 = vector.shape_cast %65 : vector<128xf32> to vector<1x128xf32>
    %67 = vector.broadcast %66 : vector<1x128xf32> to vector<32x128xf32>
    %68 = arith.cmpf oeq, %64, %67 : vector<32x128xf32>
    %c32_i32_23 = arith.constant 32 : i32
    %69 = vector.broadcast %c32_i32_23 : i32 to vector<32x128xi32>
    %70 = arith.select %68, %20, %69 : vector<32x128xi1>, vector<32x128xi32>
    %cst_24 = arith.constant dense<2147483647> : vector<128xi32>
    %71 = vector.multi_reduction <minsi>, %70, %cst_24 [0] : vector<32x128xi32> to vector<128xi32>
    %72 = vector.shape_cast %71 : vector<128xi32> to vector<1x128xi32>
    %73 = vector.broadcast %72 : vector<1x128xi32> to vector<32x128xi32>
    %74 = arith.cmpi eq, %20, %73 : vector<32x128xi32>
    %cst_25 = arith.constant 9.99999993E-9 : f32
    %75 = vector.broadcast %cst_25 : f32 to vector<1x128xf32>
    %76 = arith.addf %66, %75 : vector<1x128xf32>
    %77 = tpu.reciprocal %76 {approx = true} : vector<1x128xf32> -> vector<1x128xf32>
    %cst_26 = arith.constant 0.000000e+00 : f32
    %78 = vector.shape_cast %77 : vector<1x128xf32> to vector<1x128xf32>
    %79 = vector.broadcast %78 : vector<1x128xf32> to vector<32x128xf32>
    %80 = vector.broadcast %cst_26 : f32 to vector<32x128xf32>
    %81 = arith.select %74, %79, %80 : vector<32x128xi1>, vector<32x128xf32>
    %82 = arith.addf %61, %81 : vector<32x128xf32>
    %83 = arith.addf %62, %77 : vector<1x128xf32>
    %c0_27 = arith.constant 0 : index
    %c0_28 = arith.constant 0 : index
    %c0_29 = arith.constant 0 : index
    %84 = vector.load %arg4[%c0_27, %c0_28, %c0_29] : memref<1x8x32xf32, #tpu.memory_space<vmem>>, vector<1x8x32xf32>
    %85 = vector.shape_cast %84 : vector<1x8x32xf32> to vector<8x32xf32>
    %cst_30 = arith.constant dense<0.000000e+00> : vector<8x128xf32>
    %86 = tpu.matmul %85, %82, %cst_30 {dimension_numbers = #tpu.dot_dimension_numbers<[1], [0], [0], [1], [0, 0, 1, 1], [], []>} : vector<8x32xf32>, vector<32x128xf32>, vector<8x128xf32> -> vector<8x128xf32>
    %87 = tpu.reciprocal %83 {approx = true} : vector<1x128xf32> -> vector<1x128xf32>
    %88 = vector.broadcast %87 : vector<1x128xf32> to vector<8x128xf32>
    %89 = arith.mulf %86, %88 : vector<8x128xf32>
    %c0_31 = arith.constant 0 : index
    %c0_32 = arith.constant 0 : index
    %90 = vector.load %arg6[%c0_31, %c0_32] : memref<32x8xf32, #tpu.memory_space<vmem>>, vector<32x8xf32>
    %cst_33 = arith.constant dense<0.000000e+00> : vector<32x128xf32>
    %91 = tpu.matmul %90, %89, %cst_33 {dimension_numbers = #tpu.dot_dimension_numbers<[1], [0], [0], [1], [0, 0, 1, 1], [], []>} : vector<32x8xf32>, vector<8x128xf32>, vector<32x128xf32> -> vector<32x128xf32>
    %c0_34 = arith.constant 0 : index
    %c0_35 = arith.constant 0 : index
    %92 = vector.load %arg7[%c0_34, %c0_35] : memref<32x8xf32, #tpu.memory_space<vmem>>, vector<32x8xf32>
    %c0_36 = arith.constant 0 : index
    %c0_37 = arith.constant 0 : index
    %c0_38 = arith.constant 0 : index
    %93 = vector.load %arg5[%c0_36, %c0_37, %c0_38] : memref<1x8x128xf32, #tpu.memory_space<vmem>>, vector<1x8x128xf32>
    %94 = vector.shape_cast %93 : vector<1x8x128xf32> to vector<8x128xf32>
    %cst_39 = arith.constant dense<0.000000e+00> : vector<32x128xf32>
    %95 = tpu.matmul %92, %94, %cst_39 {dimension_numbers = #tpu.dot_dimension_numbers<[1], [0], [0], [1], [0, 0, 1, 1], [], []>} : vector<32x8xf32>, vector<8x128xf32>, vector<32x128xf32> -> vector<32x128xf32>
    %96 = arith.addf %91, %95 : vector<32x128xf32>
    %c0_40 = arith.constant 0 : index
    %c0_41 = arith.constant 0 : index
    %97 = vector.load %arg8[%c0_40, %c0_41] : memref<32x1xf32, #tpu.memory_space<vmem>>, vector<32x1xf32>
    %98 = vector.broadcast %97 : vector<32x1xf32> to vector<32x128xf32>
    %99 = arith.addf %96, %98 : vector<32x128xf32>
    %cst_42 = arith.constant 0.000000e+00 : f32
    %100 = vector.broadcast %cst_42 : f32 to vector<32x128xf32>
    %101 = arith.maximumf %99, %100 : vector<32x128xf32>
    %c0_43 = arith.constant 0 : index
    %c0_44 = arith.constant 0 : index
    %c0_45 = arith.constant 0 : index
    %102 = vector.load %arg9[%c0_43, %c0_44, %c0_45] : memref<1x32x128xf32, #tpu.memory_space<vmem>>, vector<1x32x128xf32>
    %103 = vector.shape_cast %102 : vector<1x32x128xf32> to vector<32x128xf32>
    %104 = vector.shape_cast %101 : vector<32x128xf32> to vector<1x32x128xf32>
    tpu.vector_store %arg9[%c0_43, %c0_44, %c0_45], %104 {strides = array<i32>} : memref<1x32x128xf32, #tpu.memory_space<vmem>>, vector<1x32x128xf32>,
    return
  }
  func.func @transform_0(%arg0: i32, %arg1: i32) -> (i32, i32, i32) {
    %c0_i32 = arith.constant 0 : i32
    %c0_i32_0 = arith.constant 0 : i32
    return %arg0, %c0_i32, %arg1 : i32, i32, i32
  }
  func.func @transform_1(%arg0: i32, %arg1: i32) -> (i32, i32, i32) {
    %c0_i32 = arith.constant 0 : i32
    %c0_i32_0 = arith.constant 0 : i32
    %c0_i32_1 = arith.constant 0 : i32
    return %arg0, %c0_i32, %c0_i32_0 : i32, i32, i32
  }
  func.func @transform_2(%arg0: i32, %arg1: i32) -> (i32, i32, i32) {
    %c0_i32 = arith.constant 0 : i32
    %c0_i32_0 = arith.constant 0 : i32
    %c0_i32_1 = arith.constant 0 : i32
    return %arg0, %c0_i32, %c0_i32_0 : i32, i32, i32
  }
  func.func @transform_3(%arg0: i32, %arg1: i32) -> (i32, i32, i32) {
    %c0_i32 = arith.constant 0 : i32
    %c0_i32_0 = arith.constant 0 : i32
    return %arg0, %c0_i32, %arg1 : i32, i32, i32
  }
  func.func @transform_4(%arg0: i32, %arg1: i32) -> (i32, i32) {
    %c0_i32 = arith.constant 0 : i32
    %c0_i32_0 = arith.constant 0 : i32
    %c0_i32_1 = arith.constant 0 : i32
    return %c0_i32, %c0_i32_0 : i32, i32
  }
  func.func @transform_5(%arg0: i32, %arg1: i32) -> (i32, i32) {
    %c0_i32 = arith.constant 0 : i32
    %c0_i32_0 = arith.constant 0 : i32
    %c0_i32_1 = arith.constant 0 : i32
    return %c0_i32, %c0_i32_0 : i32, i32
  }
  func.func @transform_6(%arg0: i32, %arg1: i32) -> (i32, i32) {
    %c0_i32 = arith.constant 0 : i32
    %c0_i32_0 = arith.constant 0 : i32
    %c0_i32_1 = arith.constant 0 : i32
    return %c0_i32, %c0_i32_0 : i32, i32
  }
  func.func @transform_7(%arg0: i32, %arg1: i32) -> (i32, i32, i32) {
    %c0_i32 = arith.constant 0 : i32
    %c0_i32_0 = arith.constant 0 : i32
    return %arg0, %c0_i32, %arg1 : i32, i32, i32
  }
}

</mosaic_0001>

<bundles_post_ra>
// kernel: tpu_custom_call.1
= control target key start
LH: loop header
LB: loop body
LE: loop exit
PB: predicated region body
PF: predicated region fallthrough
CT: control target
= control target key end

     0   :  { %12 = vsyncpa [#allocation3], 0  ;;  %s1661_s0 = inlined_call_operand.vmem [shape: f32[2,3,128], index: 0, kind: input, shape index: {}]   ;;  %s1662_s1 = inlined_call_operand.vmem [shape: f32[2,3,32], index: 1, kind: input, shape index: {}]   ;;  %s1663_s2 = inlined_call_operand.vmem [shape: f32[2,8,32], index: 2, kind: input, shape index: {}]   ;;  %s1664_s3 = inlined_call_operand.vmem [shape: f32[2,8,128], index: 3, kind: input, shape index: {}]   ;;  %s1665_s4 = inlined_call_operand.vmem [shape: f32[32,8], index: 4, kind: input, shape index: {}]   ;;  %s1666_s5 = inlined_call_operand.vmem [shape: f32[32,8], index: 5, kind: input, shape index: {}]   ;;  %s1667_s6 = inlined_call_operand.vmem [shape: f32[32,1], index: 6, kind: input, shape index: {}]   ;;  %s1668_s7 = inlined_call_operand.hbm [shape: f32[2,32,128], index: 7, kind: output, shape index: {}]  }
   0x1   :  { %14 = vsyncpa [#allocation3 + $0x1], 0  ;;  %s1430_s24 = smov 0   ;;  %s1432_s25 = smov 0  }
   0x2   :  { %s1434_s26 = smov 0   ;;  %s1436_s27 = smov 0  }
   0x3   :  { %s1438_s28 = smov 0   ;;  %s1440_s29 = smov 0  }
   0x4 LB: > { %s1137_s30 = sadd.s32 4294967295, %s1381_s29   ;;  %s1138_s8 = sadd.s32 4294967294, %s1381_s29   ;;  %s1381_s29 = sphi %s1440_s29, %s20_s29   ;;  %s1377_s28 = sphi %s1438_s28, %s1675_s28   ;;  %s1373_s27 = sphi %s1436_s27, %s1674_s27   ;;  %s1369_s26 = sphi %s1434_s26, %s1673_s26   ;;  %s1365_s25 = sphi %s1432_s25, %s1672_s25   ;;  %s1361_s24 = sphi %s1430_s24, %s1671_s24  }
   0x5   : > { %s32_s9 = sadd.s32 1, %s1377_s28  ;;  %s212_s10 = sadd.s32 1, %s1369_s26 }
   0x6   : > { %p34_p0 = scmp.ge.s32.totalorder %s32_s9, 2  ;;  %p222_p1 = scmp.ne.s32.totalorder %s1369_s26, %s1365_s25 }
   0x7   : > { %p223_p2 = scmp.eq.s32.totalorder %s1137_s30, 1  ;;  %p228_p3 = scmp.ne.s32.totalorder %s1365_s25, %s1361_s24 }
   0x8   : > { %s1677_s9 = smov (%p34_p0, %s32_s9), 0  ;;  %p229_p5 = scmp.eq.s32.totalorder %s1138_s8, 1 }
   0x9   : > { %p1470_p4 = por %p223_p2, %p222_p1  ;;  %s207_s12 = ssub.s32 %s1377_s28, %s1677_s9 }
   0xa   : > { %p1141_p6 = scmp.ge.s32.totalorder %s1381_s29, 1  ;;  %p210_p7 = scmp.eq.s32.totalorder %s207_s12, 0 }
   0xb   : > { %p1477_p8 = por %p229_p5, %p228_p3  ;;  %p290_p9 = scmp.lt.s32.totalorder %s1381_s29, 3 }
   0xc   : > { %s1483_s14 = scalar_select %p210_p7, %s1369_s26, %s212_s10  }
   0xd   : > { %p291_p10 = pnand %p1141_p6, %p290_p9 }
   0xe   : > { %p339_p11 = scmp.lt.s32.totalorder (!%p291_p10), %s1373_s27, 1  ;;  %vm408_vm0 = vcmask (!%p291_p10), 1042432   ;;  %vm395_vm1 = vcmask (!%p291_p10), 23552   ;;  %v1383_v19 = vmov (!%p291_p10), 0.0|0.0   ;;  %vm1384_vm2 = vmmov (!%p291_p10), 0   ;;  %v772_v43 = vld [vmem:[%s1666_s5] sm:$0xff] (!%p291_p10) }
   0xf   : > { %294 = sbr.rel (%p291_p10) target bundleno = 960 (0x3c0), region = 48  ;;  %v1385_v37 = vmov (!%p291_p10), 0.0   ;;  %vm777_vm3 = vcmask (!%p291_p10), 64512   ;;  %v773_v47 = vld [vmem:[%s1666_s5 + $0x8] sm:$0xff] (!%p291_p10)  ;;  %v537_v55 = vlaneseq (!%p291_p10)  ;;  %s1166_s20 = sshll.u32 (!%p291_p10), %s1373_s27, 9 }
  0x10   : > { %1208 = vmatprep.mubr.msk.f32.mxu0 (!%p291_p10), %vm777_vm3, %v772_v43  ;;  %s1613_s30 = scalar_lea.hbm (!%p291_p10), %s1668_s7, %s1166_s20 }
  0x11   : > { %v1525_v58 = vshrl.u32 (!%p291_p10), %v537_v55, 7 }
  0x13   : > { %v1528_v61 = vadd.s32 (!%p291_p10), 8, %v1525_v58  ;;  %v1531_v62 = vadd.s32 (!%p291_p10), 16, %v1525_v58  ;;  %v1534_v63 = vadd.s32 (!%p291_p10), 24, %v1525_v58 }
  0x16   : > { %s1487_s15 = scalar_select %p339_p11, %s1373_s27, 1 }
  0x17   : > { %s1387_s27 = smov [#allocation2]  }
  0x18   : > { %s1143_s16 = sshll.u32 %s1487_s15, 2  ;;  %s1145_s23 = sshll.u32 %s1487_s15, 3 }
  0x19   : > { %s349_s19 = scalar_lea.vmem %s1662_s1, %s1143_s16  ;;  %s345_s22 = scalar_lea.vmem %s1661_s0, %s1143_s16 }
  0x1a   : > { %v362_v0 = vld [vmem:[%s349_s19] sm:$0x7]  ;;  %s360_s10 = scalar_lea.vmem %s1664_s3, %s1145_s23  ;;  %s353_s21 = scalar_lea.vmem %s1663_s2, %s1145_s23 }
  0x1b   : > { %363 = vxpose.xlu0.b32.start.end [1/1] (short) (narrow) %v362_v0, 32  ;;  %v361_v1 = vld [vmem:[%s345_s22] sm:$0x7]  ;;  %s336_s16 = sand.u32 1, %s1365_s25   ;;  %s1307_s15 = sshll.u32 %s1387_s27, 4  ;;  %s1308_s15 = int_to_ptr.vmem [resolvable:$false] %s1307_s15 }
  0x1c   : > { %1187 = vmatprep.subr.msk.mxu1 %vm408_vm0, %v361_v1  ;;  %v513_v2 = vmul.f32 %v361_v1, %v361_v1  ;;  %v776_v46 = vld [vmem:[%s360_s10] sm:$0xff]  ;;  %s1142_s17 = sshll.u32 %s336_s16, 5  ;;  %s1615_s8 = scalar_lea.sflag [#allocation3], %s336_s16 }
  0x1d   : > { %1188 = vmatpush3.msk.msra.mxu1 %vm408_vm0, %v361_v1  ;;  %1206 = vmatprep.subr.mxu0 %v776_v46  ;;  %s338_s18 = scalar_lea.vmem [#allocation2], %s1142_s17  ;;  %s1309_s23 = scalar_lea.vmem %s1308_s15, 1024 }
  0x1e   : > { %v514_v3 = vsel %vm408_vm0, %v513_v2, 0.0  ;;  %1222 = vmatprep.subr.bf16.mxu1 %v1383_v19  ;;  %1207 = vmatpush3.msra.mxu0 %v776_v46  ;;  %s1023_s19 = sshll.u32 %s338_s18, 4  ;;  %s1608_s19 = int_to_ptr.vmem [resolvable:$true] %s1023_s19 }
  0x1f   : > { %v515_v16 = vrot.slane %v514_v3, 4  ;;  %1209 = vmatmul.mubr.msk.f32.vlgmr.msra.gmra.mrb[0].mxu0 %vm777_vm3, %v773_v47  ;;  %s1303_s10 = scalar_lea.vmem %s1608_s19, 512  ;;  %p1310_p1 = scmp.lt.s32.totalorder %s1608_s19, %s1308_s15 }
  0x20   : > { %p1304_p12 = scmp.ne.s32.totalorder %s1608_s19, %s1303_s10  ;;  %p1311_p2 = scmp.lt.s32.totalorder %s1309_s23, %s1303_s10 }
  0x21   : > { %v516_v17 = vadd.f32 %v515_v16, %v514_v3 }
  0x22   : > { %p1305_p13 = pnand %p1304_p12, %p1470_p4  ;;  %p1312_p3 = por %p1311_p2, %p1310_p1 }
  0x23   : > { %v517_v18 = vrot.slane %v516_v17, 2 }
  0x24   : > { %p1306_p0 = pneg %p1305_p13 }
  0x25   : > { %v518_v20 = vadd.f32 %v517_v18, %v516_v17 }
  0x26   : > { %p1313_p5 = pnand %p1312_p3, %p1306_p0 }
  0x27   : > { %v519_v21 = vrot.slane %v518_v20, 1 }
  0x29   : > { %v520_v23 = vadd.f32 %v519_v21, %v518_v20 }
  0x9b   : > { %v379_v4 = vpop.trf.xlu0 }
  0x9c   : > { %v497_v5 = vmul.f32 %v379_v4, %v379_v4  ;;  %1189 = vmatprep.mubr.msk.f32.mxu1 %vm395_vm1, %v379_v4 }
  0x9e   : > { %v501_v6 = vsel %vm395_vm1, %v497_v5, 0.0 }
  0x9f   : > { %502 = vadd.xlane.f32.xlu0 %v501_v6  ;;  %v380_v7 = vpop.trf.xlu0 }
  0xa0   : > { %1190 = vmatmul.mubr.msk.f32.vlgmr.msra.gmra.mrb[0].mxu1 %vm395_vm1, %v380_v7  ;;  %v498_v8 = vmul.f32 %v380_v7, %v380_v7 }
  0xa2   : > { %v504_v9 = vsel %vm395_vm1, %v498_v8, 0.0 }
  0xa3   : > { %505 = vadd.xlane.f32.xlu1 %v504_v9  ;;  %v381_v10 = vpop.trf.xlu0 }
  0xa4   : > { %v499_v11 = vmul.f32 %v381_v10, %v381_v10  ;;  %1192 = vmatprep.mubr.msk.f32.mxu1 %vm395_vm1, %v381_v10 }
  0xa6   : > { %v507_v12 = vsel %vm395_vm1, %v499_v11, 0.0 }
  0xa7   : > { %508 = vadd.xlane.f32.xlu1 %v507_v12  ;;  %v382_v13 = vpop.trf.xlu0 }
  0xa8   : > { %v500_v14 = vmul.f32 %v382_v13, %v382_v13  ;;  %1193 = vmatmul.mubr.msk.f32.gmra.mrb[2].mxu1 %vm395_vm1, %v382_v13 }
  0xa9   : > { %1203 = vmatprep.mubr.msk.f32.mxu1 %vm1384_vm2, %v1385_v37 }
  0xaa   : > { %v510_v15 = vsel %vm395_vm1, %v500_v14, 0.0 }
  0xab   : > { %511 = vadd.xlane.f32.xlu1 %v510_v15 }
 0x12c   : > { %v503_v24 = vpop.xlane.xlu0 %502 }
 0x12d   : > { %v521_v30 = vadd.f32 %v520_v23, %v503_v24 }
 0x130   : > { %v506_v22 = vpop.xlane.xlu1 %505 }
 0x131   : > { %v522_v27 = vadd.f32 %v520_v23, %v506_v22 }
 0x134   : > { %v509_v25 = vpop.xlane.xlu1 %508 }
 0x135   : > { %v523_v44 = vadd.f32 %v520_v23, %v509_v25 }
 0x138   : > { %v512_v35 = vpop.xlane.xlu1 %511 }
 0x139   : > { %v524_v40 = vadd.f32 %v520_v23, %v512_v35 }
 0x173   : > { %v1191_v26 = vpop.f32.mrb[0].mxu1 }
 0x174   : > { %v526_v28 = vmul.f32 2.0, %v1191_v26  ;;  %v478_v29 = vpop.f32.mrb[1].mxu1 }
 0x175   : > { %v525_v31 = vmul.f32 2.0, %v478_v29 }
 0x176   : > { %v530_v32 = vsub.f32 %v522_v27, %v526_v28 }
 0x177   : > { %v529_v33 = vsub.f32 %v521_v30, %v525_v31 }
 0x178   : > { %v1505_v34 = vmax.f32 %v530_v32, 0.0 }
 0x179   : > { %v1507_v36 = vmax.f32 %v529_v33, 0.0 }
 0x17b   : > { %v542_v38 = vmin.f32 %v1507_v36, %v1505_v34  ;;  %v1194_v39 = vpop.f32.mrb[2].mxu1 }
 0x17c   : > { %v528_v41 = vmul.f32 2.0, %v1194_v39  ;;  %v488_v42 = vpop.f32.mrb[3].mxu1 }
 0x17d   : > { %v527_v45 = vmul.f32 2.0, %v488_v42 }
 0x17e   : > { %v532_v48 = vsub.f32 %v524_v40, %v528_v41 }
 0x17f   : > { %v531_v49 = vsub.f32 %v523_v44, %v527_v45 }
 0x180   : > { %v536_v50 = vmax.f32 %v532_v48, 0.0 }
 0x181   : > { %v535_v51 = vmax.f32 %v531_v49, 0.0 }
 0x183   : > { %v543_v52 = vmin.f32 %v535_v51, %v536_v50 }
 0x185   : > { %v544_v53 = vmin.f32 %v542_v38, %v543_v52 }
 0x187   : > { %v545_v54 = vrot.slane %v544_v53, 4 }
 0x189   : > { %v546_v56 = vmin.f32 %v544_v53, %v545_v54 }
 0x18b   : > { %v547_v57 = vrot.slane %v546_v56, 2 }
 0x18d   : > { %v548_v59 = vmin.f32 %v546_v56, %v547_v57 }
 0x18f   : > { %v549_v60 = vrot.slane %v548_v59, 1 }
 0x191   : > { %v550_v0 = vmin.f32 %v548_v59, %v549_v60 }
 0x193   : > { %vm551_vm4 = vcmp.eq.f32.partialorder %v1507_v36, %v550_v0  ;;  %vm552_vm5 = vcmp.eq.f32.partialorder %v1505_v34, %v550_v0  ;;  %vm553_vm6 = vcmp.eq.f32.partialorder %v535_v51, %v550_v0  ;;  %vm554_vm7 = vcmp.eq.f32.partialorder %v536_v50, %v550_v0 }
 0x194   : > { %v555_v1 = vsel %vm551_vm4, %v1525_v58, 32  ;;  %v556_v2 = vsel %vm552_vm5, %v1528_v61, 32  ;;  %v557_v3 = vsel %vm553_vm6, %v1531_v62, 32  ;;  %v558_v4 = vsel %vm554_vm7, %v1534_v63, 32 }
 0x195   : > { %vm559_vm8 = vcmp.lt.s32.totalorder %v555_v1, %v556_v2  ;;  %vm561_vm9 = vcmp.lt.s32.totalorder %v557_v3, %v558_v4  ;;  %v578_v7 = vadd.f32 1e-08, %v550_v0 }
 0x196   : > { %v560_v5 = vsel %vm559_vm8, %v555_v1, %v556_v2  ;;  %v562_v6 = vsel %vm561_vm9, %v557_v3, %v558_v4 }
 0x197   : > { %vm563_vm10 = vcmp.lt.s32.totalorder %v560_v5, %v562_v6  ;;  %1295 = vrcp.f32 %v578_v7 }
 0x198   : > { %v564_v8 = vsel %vm563_vm10, %v560_v5, %v562_v6 }
 0x199   : > { %v565_v9 = vrot.slane %v564_v8, 4 }
 0x19b   : > { %vm566_vm11 = vcmp.lt.s32.totalorder %v564_v8, %v565_v9 }
 0x19c   : > { %v567_v10 = vsel %vm566_vm11, %v564_v8, %v565_v9 }
 0x19d   : > { %v568_v11 = vrot.slane %v567_v10, 2 }
 0x19f   : > { %vm569_vm12 = vcmp.lt.s32.totalorder %v567_v10, %v568_v11 }
 0x1a0   : > { %v570_v12 = vsel %vm569_vm12, %v567_v10, %v568_v11 }
 0x1a1   : > { %v571_v13 = vrot.slane %v570_v12, 1  ;;  %v1296_v15 = vpop.eup %1295 }
 0x1a3   : > { %vm572_vm13 = vcmp.lt.s32.totalorder %v570_v12, %v571_v13 }
 0x1a4   : > { %v573_v14 = vsel %vm572_vm13, %v570_v12, %v571_v13 }
 0x1a5   : > { %vm574_vm14 = vcmp.eq.s32.totalorder %v1525_v58, %v573_v14  ;;  %vm575_vm15 = vcmp.eq.s32.totalorder %v1528_v61, %v573_v14  ;;  %vm576_vm0 = vcmp.eq.s32.totalorder %v1531_v62, %v573_v14  ;;  %vm577_vm1 = vcmp.eq.s32.totalorder %v1534_v63, %v573_v14 }
 0x1a6   : > { %v582_v16 = vsel %vm576_vm0, %v1296_v15, 0.0  ;;  %v589_v17 = vsel %vm574_vm14, 1e+30, %v1507_v36  ;;  %v590_v18 = vsel %vm575_vm15, 1e+30, %v1505_v34  ;;  %v580_v20 = vsel %vm574_vm14, %v1296_v15, 0.0 }
 0x1a7   : > { %v591_v21 = vsel %vm576_vm0, 1e+30, %v535_v51  ;;  %v592_v22 = vsel %vm577_vm1, 1e+30, %v536_v50  ;;  %v593_v23 = vmin.f32 %v589_v17, %v590_v18  ;;  %v581_v24 = vsel %vm575_vm15, %v1296_v15, 0.0 }
 0x1a8   : > { %v594_v25 = vmin.f32 %v591_v21, %v592_v22  ;;  %v583_v26 = vsel %vm577_vm1, %v1296_v15, 0.0 }
 0x1aa   : > { %v595_v27 = vmin.f32 %v593_v23, %v594_v25 }
 0x1ac   : > { %v596_v28 = vrot.slane %v595_v27, 4 }
 0x1ae   : > { %v597_v29 = vmin.f32 %v595_v27, %v596_v28 }
 0x1b0   : > { %v598_v30 = vrot.slane %v597_v29, 2 }
 0x1b2   : > { %v599_v31 = vmin.f32 %v597_v29, %v598_v30 }
 0x1b4   : > { %v600_v32 = vrot.slane %v599_v31, 1 }
 0x1b6   : > { %v601_v33 = vmin.f32 %v599_v31, %v600_v32 }
 0x1b8   : > { %vm602_vm2 = vcmp.eq.f32.partialorder %v589_v17, %v601_v33  ;;  %vm603_vm4 = vcmp.eq.f32.partialorder %v590_v18, %v601_v33  ;;  %vm604_vm5 = vcmp.eq.f32.partialorder %v591_v21, %v601_v33  ;;  %vm605_vm6 = vcmp.eq.f32.partialorder %v592_v22, %v601_v33 }
 0x1b9   : > { %v606_v34 = vsel %vm602_vm2, %v1525_v58, 32  ;;  %v607_v35 = vsel %vm603_vm4, %v1528_v61, 32  ;;  %v608_v36 = vsel %vm604_vm5, %v1531_v62, 32  ;;  %v609_v37 = vsel %vm605_vm6, %v1534_v63, 32 }
 0x1ba   : > { %vm610_vm7 = vcmp.lt.s32.totalorder %v606_v34, %v607_v35  ;;  %vm612_vm8 = vcmp.lt.s32.totalorder %v608_v36, %v609_v37  ;;  %v629_v38 = vadd.f32 1e-08, %v601_v33 }
 0x1bb   : > { %v611_v39 = vsel %vm610_vm7, %v606_v34, %v607_v35  ;;  %v613_v40 = vsel %vm612_vm8, %v608_v36, %v609_v37 }
 0x1bc   : > { %vm614_vm9 = vcmp.lt.s32.totalorder %v611_v39, %v613_v40  ;;  %1297 = vrcp.f32 %v629_v38  ;;  %v1386_v38 = vmov 0  }
 0x1bd   : > { %v615_v41 = vsel %vm614_vm9, %v611_v39, %v613_v40  ;;  %1293 = vset.pattern.permute.xlu1 %v1386_v38  ;;  %1294 = vset.pattern.permute.xlu0 %v1386_v38  ;;  %v973_v39 = vld [vmem:[%s1667_s6 + $0x8] sm:$0xff]  ;;  %v974_v40 = vld [vmem:[%s1667_s6 + $0x10] sm:$0xff] }
 0x1be   : > { %v616_v42 = vrot.slane %v615_v41, 4 }
 0x1c0   : > { %vm617_vm10 = vcmp.lt.s32.totalorder %v615_v41, %v616_v42 }
 0x1c1   : > { %v618_v43 = vsel %vm617_vm10, %v615_v41, %v616_v42  ;;  %v975_v41 = vld [vmem:[%s1667_s6 + $0x18] sm:$0xff] }
 0x1c2   : > { %v619_v44 = vrot.slane %v618_v43, 2 }
 0x1c4   : > { %vm620_vm11 = vcmp.lt.s32.totalorder %v618_v43, %v619_v44 }
 0x1c5   : > { %v621_v45 = vsel %vm620_vm11, %v618_v43, %v619_v44 }
 0x1c6   : > { %v1298_v46 = vpop.eup %1297  ;;  %v622_v47 = vrot.slane %v621_v45, 1 }
 0x1c7   : > { %v639_v48 = vadd.f32 %v1298_v46, %v1296_v15 }
 0x1c8   : > { %vm623_vm12 = vcmp.lt.s32.totalorder %v621_v45, %v622_v47 }
 0x1c9   : > { %v624_v49 = vsel %vm623_vm12, %v621_v45, %v622_v47  ;;  %v770_v47 = vld [vmem:[%s1665_s4 + $0x10] sm:$0xff] }
 0x1ca   : > { %vm625_vm13 = vcmp.eq.s32.totalorder %v1525_v58, %v624_v49  ;;  %vm626_vm14 = vcmp.eq.s32.totalorder %v1528_v61, %v624_v49  ;;  %vm627_vm15 = vcmp.eq.s32.totalorder %v1531_v62, %v624_v49  ;;  %vm628_vm0 = vcmp.eq.s32.totalorder %v1534_v63, %v624_v49 }
 0x1cb   : > { %v633_v50 = vsel %vm627_vm15, %v1298_v46, 0.0  ;;  %v640_v51 = vsel %vm625_vm13, 1e+30, %v589_v17  ;;  %v641_v52 = vsel %vm626_vm14, 1e+30, %v590_v18  ;;  %v631_v53 = vsel %vm625_vm13, %v1298_v46, 0.0 }
 0x1cc   : > { %v637_v54 = vadd.f32 %v633_v50, %v582_v16  ;;  %v642_v55 = vsel %vm627_vm15, 1e+30, %v591_v21  ;;  %v643_v56 = vsel %vm628_vm0, 1e+30, %v592_v22  ;;  %v644_v57 = vmin.f32 %v640_v51, %v641_v52 }
 0x1cd   : > { %v645_v59 = vmin.f32 %v642_v55, %v643_v56  ;;  %v632_v60 = vsel %vm626_vm14, %v1298_v46, 0.0  ;;  %v635_v0 = vadd.f32 %v631_v53, %v580_v20  ;;  %v634_v1 = vsel %vm628_vm0, %v1298_v46, 0.0  ;;  %v769_v46 = vld [vmem:[%s1665_s4 + $0x8] sm:$0xff] }
 0x1ce   : > { %v636_v2 = vadd.f32 %v632_v60, %v581_v24  ;;  %v638_v3 = vadd.f32 %v634_v1, %v583_v26  ;;  %vm692_vm0 = vcmask 261120  }
 0x1cf   : > { %v646_v4 = vmin.f32 %v644_v57, %v645_v59 }
 0x1d1   : > { %v647_v5 = vrot.slane %v646_v4, 4 }
 0x1d3   : > { %v648_v6 = vmin.f32 %v646_v4, %v647_v5 }
 0x1d5   : > { %v649_v7 = vrot.slane %v648_v6, 2 }
 0x1d7   : > { %v650_v8 = vmin.f32 %v648_v6, %v649_v7 }
 0x1d9   : > { %v651_v9 = vrot.slane %v650_v8, 1 }
 0x1db   : > { %v652_v10 = vmin.f32 %v650_v8, %v651_v9 }
 0x1dd   : > { %vm653_vm1 = vcmp.eq.f32.partialorder %v640_v51, %v652_v10  ;;  %vm654_vm2 = vcmp.eq.f32.partialorder %v641_v52, %v652_v10  ;;  %vm655_vm4 = vcmp.eq.f32.partialorder %v642_v55, %v652_v10  ;;  %vm656_vm5 = vcmp.eq.f32.partialorder %v643_v56, %v652_v10 }
 0x1de   : > { %v657_v11 = vsel %vm653_vm1, %v1525_v58, 32  ;;  %v658_v12 = vsel %vm654_vm2, %v1528_v61, 32  ;;  %v659_v13 = vsel %vm655_vm4, %v1531_v62, 32  ;;  %v660_v14 = vsel %vm656_vm5, %v1534_v63, 32 }
 0x1df   : > { %vm661_vm6 = vcmp.lt.s32.totalorder %v657_v11, %v658_v12  ;;  %vm663_vm7 = vcmp.lt.s32.totalorder %v659_v13, %v660_v14  ;;  %v680_v15 = vadd.f32 1e-08, %v652_v10 }
 0x1e0   : > { %v662_v16 = vsel %vm661_vm6, %v657_v11, %v658_v12  ;;  %v664_v17 = vsel %vm663_vm7, %v659_v13, %v660_v14 }
 0x1e1   : > { %vm665_vm8 = vcmp.lt.s32.totalorder %v662_v16, %v664_v17  ;;  %1299 = vrcp.f32 %v680_v15 }
 0x1e2   : > { %v666_v18 = vsel %vm665_vm8, %v662_v16, %v664_v17 }
 0x1e3   : > { %v667_v20 = vrot.slane %v666_v18, 4 }
 0x1e5   : > { %vm668_vm9 = vcmp.lt.s32.totalorder %v666_v18, %v667_v20 }
 0x1e6   : > { %v669_v21 = vsel %vm668_vm9, %v666_v18, %v667_v20 }
 0x1e7   : > { %v670_v22 = vrot.slane %v669_v21, 2 }
 0x1e9   : > { %vm671_vm10 = vcmp.lt.s32.totalorder %v669_v21, %v670_v22 }
 0x1ea   : > { %v672_v23 = vsel %vm671_vm10, %v669_v21, %v670_v22 }
 0x1eb   : > { %v1300_v24 = vpop.eup %1299  ;;  %v673_v25 = vrot.slane %v672_v23, 1 }
 0x1ec   : > { %v690_v26 = vadd.f32 %v1300_v24, %v639_v48  ;;  %v771_v48 = vld [vmem:[%s1665_s4 + $0x18] sm:$0xff] }
 0x1ed   : > { %vm674_vm11 = vcmp.lt.s32.totalorder %v672_v23, %v673_v25 }
 0x1ee   : > { %v675_v27 = vsel %vm674_vm11, %v672_v23, %v673_v25  ;;  %1301 = vrcp.f32 %v690_v26 }
 0x1ef   : > { %vm676_vm12 = vcmp.eq.s32.totalorder %v1525_v58, %v675_v27  ;;  %vm677_vm13 = vcmp.eq.s32.totalorder %v1528_v61, %v675_v27  ;;  %vm678_vm14 = vcmp.eq.s32.totalorder %v1531_v62, %v675_v27  ;;  %vm679_vm15 = vcmp.eq.s32.totalorder %v1534_v63, %v675_v27  ;;  %v691_v58 = vld [vmem:[%s353_s21] sm:$0xff]  ;;  %v774_v61 = vld [vmem:[%s1666_s5 + $0x10] sm:$0xff]  ;;  %v775_v62 = vld [vmem:[%s1666_s5 + $0x18] sm:$0xff] }
 0x1f0   : > { %v682_v28 = vsel %vm676_vm12, %v1300_v24, 0.0  ;;  %v683_v29 = vsel %vm677_vm13, %v1300_v24, 0.0  ;;  %v684_v30 = vsel %vm678_vm14, %v1300_v24, 0.0  ;;  %v685_v31 = vsel %vm679_vm15, %v1300_v24, 0.0  ;;  %1211 = vmatprep.mubr.msk.f32.mxu0 %vm777_vm3, %v774_v61  ;;  %v972_v63 = vld [vmem:[%s1667_s6] sm:$0xff] }
 0x1f1   : > { %v686_v32 = vadd.f32 %v682_v28, %v635_v0  ;;  %v687_v33 = vadd.f32 %v683_v29, %v636_v2  ;;  %v688_v34 = vadd.f32 %v684_v30, %v637_v54  ;;  %v689_v35 = vadd.f32 %v685_v31, %v638_v3  ;;  %1212 = vmatmul.mubr.msk.f32.gmra.mrb[2].mxu0 %vm777_vm3, %v775_v62 }
 0x1f2   : > { %978 = vperm.xlu1 %1293, %v972_v63  }
 0x1f3   : > { %v1223_v36 = vpack.c.bf16 %v687_v33, %v686_v32  ;;  %v1226_v37 = vpack.c.bf16 %v689_v35, %v688_v34 }
 0x1f5   : > { %1224 = vmatpush3.bf16.msra.mxu1 %v1223_v36 }
 0x1f6   : > { %1225 = vmatprep.subr.bf16.mxu1 %v1383_v19  ;;  %v768_v19 = vld [vmem:[%s1665_s4] sm:$0xff]  ;;  %983 = vperm.xlu1 %1293, %v973_v39  }
 0x1f7   : > { %1216 = vmatprep.mubr.msk.f32.mxu0 %vm777_vm3, %v768_v19 }
 0x1f8   : > { %v1302_v42 = vpop.eup %1301 }
 0x1f9   : > { %1227 = vmatpush3.bf16.msra.mxu1 %v1226_v37 }
 0x1fa   : > { %988 = vperm.xlu1 %1293, %v974_v40  }
 0x1fc   : > { %1204 = vmatmul.mubr.msk.f32.vlgmr.msra.gmra.mrb[4].mxu1 %vm692_vm0, %v691_v58 }
 0x1fe   : > { %993 = vperm.xlu1 %1293, %v975_v41  }
 0x271   : > { %v979_v49 = vpop.permute.xlu1 %978 }
 0x275   : > { %v984_v50 = vpop.permute.xlu1 %983 }
 0x279   : > { %v989_v51 = vpop.permute.xlu1 %988 }
 0x27d   : > { %v994_v57 = vpop.permute.xlu1 %993 }
 0x2cf   : > { %v762_v43 = vpop.f32.mrb[4].mxu1 }
 0x2d0   : > { %v767_v44 = vmul.f32 %v1302_v42, %v762_v43  ;;  %v1205_v45 = vpop.f32.mrb[5].mxu1 }
 0x2d2   : > { %1214 = vmatprep.subr.mxu0 %v767_v44 }
 0x2d3   : > { %1215 = vmatpush3.msra.mxu0 %v767_v44 }
 0x2d4   : > { %1217 = vmatmul.mubr.msk.f32.vlgmr.msra.gmra.mrb[0].mxu0 %vm777_vm3, %v769_v46 }
 0x2d5   : > { %1219 = vmatprep.mubr.msk.f32.mxu0 %vm777_vm3, %v770_v47 }
 0x2d8   : > { %1220 = vmatmul.mubr.msk.f32.gmra.mrb[2].mxu0 %vm777_vm3, %v771_v48 }
 0x3a7   : > { %v1218_v52 = vpop.f32.mrb[0].mxu0 }
 0x3a8   : > { %v997_v53 = vadd.f32 %v1218_v52, %v984_v50  ;;  %v953_v54 = vpop.f32.mrb[1].mxu0 }
 0x3a9   : > { %v996_v55 = vadd.f32 %v979_v49, %v953_v54 }
 0x3aa   : > { %v1001_v56 = vmax.f32 %v997_v53, 0.0 }
 0x3ab   : > { %v1000_v59 = vmax.f32 %v996_v55, 0.0  ;;  %v1221_v60 = vpop.f32.mrb[2].mxu0 }
 0x3ac   : > { %1005 = vst [vmem:[%s338_s18 + $0x8] sm:$0xff] %v1001_v56  ;;  %v999_v0 = vadd.f32 %v1221_v60, %v994_v57  ;;  %v963_v1 = vpop.f32.mrb[3].mxu0 }
 0x3ad   : > { %1004 = vst [vmem:[%s338_s18] sm:$0xff] %v1000_v59  ;;  %v998_v2 = vadd.f32 %v989_v51, %v963_v1 }
 0x3ae   : > { %v1003_v3 = vmax.f32 %v999_v0, 0.0 }
 0x3af   : > { %v1002_v4 = vmax.f32 %v998_v2, 0.0 }
 0x3b0   : > { %1007 = vst [vmem:[%s338_s18 + $0x18] sm:$0xff] %v1003_v3 }
 0x3b1   : > { %1006 = vst [vmem:[%s338_s18 + $0x10] sm:$0xff] %v1002_v4 }
 0x3b2   : > { %1316 = shalt.err (!%p1313_p5)
}
 0x3b3   : > { %s1317_s12 = scalar_lea.hbm %s1613_s30, 512  ;;  %s1321_s18 = scalar_lea.hbm %s1668_s7, 1024 }
 0x3b4   : > { %p1318_p6 = scmp.ne.s32.totalorder %s1613_s30, %s1317_s12  ;;  %p1322_p10 = scmp.lt.u32.totalorder %s1613_s30, %s1668_s7 }
 0x3b5   : > { %p1323_p11 = scmp.lt.u32.totalorder %s1321_s18, %s1317_s12  ;;  %p1325_p13 = scmp.lt.u32.totalorder %s1317_s12, %s1613_s30 }
 0x3b6   : > { %p1319_p7 = pnand %p1318_p6, %p1470_p4 }
 0x3b7   : > { %p1324_p12 = por %p1323_p11, %p1322_p10 }
 0x3b8   : > { %p1320_p9 = pneg %p1319_p7 }
 0x3b9   : > { %p1326_p0 = por %p1325_p13, %p1324_p12 }
 0x3bb   : > { %p1327_p1 = pnand %p1326_p0, %p1320_p9 }
 0x3bd   : > { %1330 = shalt.err (!%p1327_p1)
}
 0x3be   : > { %s1388_s22 = smov 128   ;;  %s1389_s10 = smov 8  }
 0x3bf   : > { %1232 = dma.vmem_to_hbm [thread:$0]  (%p1470_p4), %s1608_s19, 512, %s1613_s30, %s1615_s8, %s1388_s22, %s1388_s22, %s1389_s10  }
 0x3c0 PF: > { %p1238_p2 = scmp.ge.s32.totalorder %s1381_s29, 2  ;;  %s1038_s27 = sand.u32 1, %s1361_s24  }
 0x3c1   : > { %s1039_s15 = scalar_lea.sflag [#allocation3], %s1038_s27 }
 0x3c2   : > { %p1235_p3 = pnand %p1238_p2, %p1477_p8 }
 0x3c4   : > { %1356 = dma.done.wait (!%p1235_p3), %s1039_s15, 512  }
 0x3c5   : > { %1358 = vsyncadd (!%p1235_p3), %s1039_s15, 4294966784  ;;  %s20_s29 = sadd.s32 1, %s1381_s29   ;;  %s1671_s24 = smov %s1365_s25 }
 0x3c6   : > { %p17_p5 = scmp.ge.s32.totalorder %s20_s29, 4   ;;  %s1672_s25 = smov %s1369_s26 }
 0x3c7   : > { %s1673_s26 = smov %s1483_s14  ;;  %s1674_s27 = smov %s1377_s28 }
 0x3c8   : > { %s1675_s28 = smov %s1677_s9  ;;  %19 = sbr.rel (!%p17_p5) target bundleno = 4 (0x4), region = 92 }
 0x3cf   :  { %1044 = vsyncpa [#allocation3], 1 }
 0x3d0   :  { %1046 = vsyncpa [#allocation3 + $0x1], 1 }

</bundles_post_ra>
